<compile_context>
chip_gen: v6e
topology: v6e:2x2x1
jax: 0.10.0
libtpu: 0.0.40
codegen_flags: <defaults>
</compile_context>

<pallas_src>
import math

import jax
import jax.numpy as jnp
from jax.experimental import pallas as pl
from jax.experimental.pallas import tpu as pltpu


def _concat_kernel(gsize_ref, gs_ref, v_ref, out_ref):
    # Block shapes: v_ref (bt, nt, Ov); out_ref (bt, nt, Ov+O);
    # gsize_ref (b, 1) / gs_ref (b, O) are whole-array VMEM residents.
    bt, nt, Ov = v_ref.shape
    O = gs_ref.shape[-1]

    row0 = pl.multiple_of(pl.program_id(0) * bt, bt)
    node0 = pl.program_id(1) * nt

    sz = gsize_ref[pl.ds(row0, bt), :]                          # (bt, 1) int32
    gs = gs_ref[pl.ds(row0, bt), :].astype(out_ref.dtype)       # (bt, O)

    # Lane-full mask built directly at select shape (no trailing-dim-1 broadcast).
    node_idx = jax.lax.broadcasted_iota(jnp.int32, (bt, nt, O), 1) + node0
    mask = node_idx < sz[:, :, None]                            # (bt, nt, O)

    gvals = jnp.where(mask, gs[:, None, :], jnp.zeros((), out_ref.dtype))

    # Single lane-dense store of the assembled tile (no partial-lane slice stores).
    out_ref[...] = jnp.concatenate(
        [v_ref[...].astype(out_ref.dtype), gvals], axis=-1)


def _num_tensorcores():
    """Best-effort TensorCores-per-chip count (perf heuristic only; never affects correctness)."""
    try:
        kind = jax.devices()[0].device_kind.lower()
    except Exception:
        return 1
    if "v7" in kind or "v4" in kind or "v5p" in kind:
        return 2
    return 1


def _pick_tiles(b, N, Ov, O, itemsize, num_cores, target_block_bytes=8 << 20):
    """Choose (bt, nt): batch rows and node rows fused per grid step."""
    per_node = (2 * Ov + O) * itemsize          # V read + fused write per (row, node)

    # --- node axis: keep nt * per_node under target even at bt = 1 (v7x 64 MiB VMEM) ---
    nt = N
    if N * per_node > target_block_bytes:
        best = None
        for d in range(8, N, 8):                 # multiple-of-8 divisors of N
            if N % d == 0 and d * per_node <= target_block_bytes:
                best = d
        if best is None and N % 8 == 0:
            best = 8
        if best is not None:
            nt = best
        # else: N has no multiple-of-8 divisor; keep nt = N.
        # TODO(synk): partial node blocks for pathological N that still exceed target.

    # --- batch axis: fill the target block, exact divisor of b ---
    node_block_bytes = nt * per_node
    bt = max(1, min(b, int(target_block_bytes // max(node_block_bytes, 1))))
    while b % bt:
        bt -= 1

    if num_cores > 1:
        # v7x / megacore: make the batch (parallel) step count a multiple of the core
        # count when achievable, so both TensorCores stream full blocks.
        cand = bt
        while cand > 1 and (b // cand) % num_cores != 0:
            cand -= 1
            while cand > 1 and b % cand:
                cand -= 1
        if cand >= 1 and b % cand == 0 and (b // cand) % num_cores == 0:
            bt = cand
    return bt, nt


def _vmem_limit_bytes(b, bt, nt, Ov, O, v_itemsize, gs_itemsize, out_itemsize):
    v_block = bt * nt * Ov * v_itemsize
    out_block = bt * nt * (Ov + O) * out_itemsize
    resident = b * 4 + b * O * gs_itemsize       # graph_size column + projected gs
    # Double-buffered pipelined operands + resident small arrays + Mosaic scratch margin.
    need = 2 * (v_block + out_block) + 2 * resident + (4 << 20)
    return int(min(max(need, 16 << 20), 48 << 20))


def graph_node_cat_global_features(V, global_state, graph_size, weight):
    b, N, Ov = V.shape
    G, O = weight.shape

    # Hoisted projection: one batched MXU matmul for all rows (mols == 1 path:
    # no bias, no relu).  This is also the module's second return value.
    gs = jnp.dot(global_state, weight,
                 preferred_element_type=jnp.float32).astype(global_state.dtype)

    out_dtype = jnp.result_type(V.dtype, gs.dtype)
    num_cores = _num_tensorcores()
    bt, nt = _pick_tiles(b, N, Ov, O, jnp.dtype(out_dtype).itemsize, num_cores)
    grid = (b // bt, N // nt)

    vmem_limit = _vmem_limit_bytes(
        b, bt, nt, Ov, O,
        jnp.dtype(V.dtype).itemsize,
        jnp.dtype(gs.dtype).itemsize,
        jnp.dtype(out_dtype).itemsize)

    out = pl.pallas_call(
        _concat_kernel,
        out_shape=jax.ShapeDtypeStruct((b, N, Ov + O), out_dtype),
        grid=grid,
        in_specs=[
            # Tiny arrays: whole-array VMEM residents (full-extent blocks, no tiling).
            pl.BlockSpec((b, 1), lambda i, j: (0, 0)),      # graph_size column (int32)
            pl.BlockSpec((b, O), lambda i, j: (0, 0)),      # projected global state
            # Streamed node features, tiled on batch and node axes.
            pl.BlockSpec((bt, nt, Ov), lambda i, j: (i, j, 0)),
        ],
        out_specs=pl.BlockSpec((bt, nt, Ov + O), lambda i, j: (i, j, 0)),
        compiler_params=pltpu.CompilerParams(
            dimension_semantics=("parallel", "parallel"),
            vmem_limit_bytes=vmem_limit,
        ),
    )(graph_size.reshape(b, 1).astype(jnp.int32), gs, V)

    return out, gs


if __name__ == "__main__":
    key = jax.random.PRNGKey(0)
    b, N, Ov = 2, 8, 16          # batch, nodes-per-graph, node feature dim
    G, O = 32, 16                # global_feats, out_feats

    kv, kg, kw = jax.random.split(key, 3)
    V = jax.random.normal(kv, (b, N, Ov), dtype=jnp.float32)
    global_state = jax.random.normal(kg, (b, G), dtype=jnp.float32)
    graph_size = jnp.array([5, 8], dtype=jnp.int32)

    # Deterministic parameter init matching reset_parameters():
    #   xavier_uniform_ on weight; bias filled with 0.01 (unused when mols == 1).
    bound = math.sqrt(6.0 / (G + O))
    weight = jax.random.uniform(kw, (G, O), minval=-bound, maxval=bound,
                                dtype=jnp.float32)
    bias = jnp.full((O,), 0.01, dtype=jnp.float32)  # not applied on the mols==1 path

    out, gs = graph_node_cat_global_features(V, global_state, graph_size, weight)
    out = jax.block_until_ready(out)
    gs = jax.block_until_ready(gs)

    # Pure-JAX reference for the exact semantics.
    gs_ref = global_state @ weight
    mask = jnp.arange(N)[None, :, None] < graph_size[:, None, None]
    out_ref = jnp.concatenate(
        [V, jnp.where(mask, gs_ref[:, None, :], 0.0)], axis=-1)

    assert out.shape == (b, N, Ov + O)
    assert gs.shape == (b, O)
    assert jnp.allclose(out, out_ref, atol=1e-5), "output mismatch"
    assert jnp.allclose(gs, gs_ref, atol=1e-5), "global_state mismatch"
    print("KERNEL_OK")
</pallas_src>

<mosaic_0001>
module attributes {stable_mosaic.version = 11 : i64} {
  func.func @_concat_kernel(%arg0: i32, %arg1: i32, %arg2: memref<2x1xi32, #tpu.memory_space<vmem>>, %arg3: memref<2x16xf32, #tpu.memory_space<vmem>>, %arg4: memref<2x8x16xf32, #tpu.memory_space<vmem>>, %arg5: memref<2x8x32xf32, #tpu.memory_space<vmem>>) attributes {dimension_semantics = [#tpu.dimension_semantics<parallel>, #tpu.dimension_semantics<parallel>], iteration_bounds = array<i64: 1, 1>, scalar_prefetch = 0 : i64, scratch_operands = 0 : i64, tpu.core_type = #tpu.core_type<tc>, window_params = [{pipeline_mode = #tpu.pipeline_mode<synchronous>, transform_indices = @transform_0, window_bounds = array<i64: 2, 1>}, {pipeline_mode = #tpu.pipeline_mode<synchronous>, transform_indices = @transform_1, window_bounds = array<i64: 2, 16>}, {transform_indices = @transform_2, window_bounds = array<i64: 2, 8, 16>}, {transform_indices = @transform_3, window_bounds = array<i64: 2, 8, 32>}]} {
    %c2_i32 = arith.constant 2 : i32
    %0 = arith.muli %arg0, %c2_i32 : i32
    %1 = tpu.assume_multiple %0, 2 : i32
    %c8_i32 = arith.constant 8 : i32
    %2 = arith.muli %arg1, %c8_i32 : i32
    %3 = arith.index_cast %1 : i32 to index
    %c0 = arith.constant 0 : index
    %4 = vector.load %arg2[%3, %c0] : memref<2x1xi32, #tpu.memory_space<vmem>>, vector<2x1xi32>
    %5 = arith.index_cast %1 : i32 to index
    %c0_0 = arith.constant 0 : index
    %6 = vector.load %arg3[%5, %c0_0] : memref<2x16xf32, #tpu.memory_space<vmem>>, vector<2x16xf32>
    %7 = tpu.iota {dimensions = array<i32: 1>} : vector<2x8x16xi32>
    %8 = vector.broadcast %2 : i32 to vector<2x8x16xi32>
    %9 = arith.addi %7, %8 : vector<2x8x16xi32>
    %10 = vector.shape_cast %4 : vector<2x1xi32> to vector<2x1x1xi32>
    %11 = vector.broadcast %10 : vector<2x1x1xi32> to vector<2x8x16xi32>
    %12 = arith.cmpi slt, %9, %11 : vector<2x8x16xi32>
    %13 = vector.shape_cast %6 : vector<2x16xf32> to vector<2x1x16xf32>
    %cst = arith.constant 0.000000e+00 : f32
    %14 = vector.shape_cast %13 : vector<2x1x16xf32> to vector<2x1x16xf32>
    %15 = vector.broadcast %14 : vector<2x1x16xf32> to vector<2x8x16xf32>
    %16 = vector.broadcast %cst : f32 to vector<2x8x16xf32>
    %17 = arith.select %12, %15, %16 : vector<2x8x16xi1>, vector<2x8x16xf32>
    %c0_1 = arith.constant 0 : index
    %c0_2 = arith.constant 0 : index
    %c0_3 = arith.constant 0 : index
    %18 = vector.load %arg4[%c0_1, %c0_2, %c0_3] : memref<2x8x16xf32, #tpu.memory_space<vmem>>, vector<2x8x16xf32>
    %19 = tpu.concatenate %18, %17 in 2 : vector<2x8x16xf32>, vector<2x8x16xf32> -> vector<2x8x32xf32>
    %c0_4 = arith.constant 0 : index
    %c0_5 = arith.constant 0 : index
    %c0_6 = arith.constant 0 : index
    %20 = vector.load %arg5[%c0_4, %c0_5, %c0_6] : memref<2x8x32xf32, #tpu.memory_space<vmem>>, vector<2x8x32xf32>
    tpu.vector_store %arg5[%c0_4, %c0_5, %c0_6], %19 {strides = array<i32>} : memref<2x8x32xf32, #tpu.memory_space<vmem>>, vector<2x8x32xf32>,
    return
  }
  func.func @transform_0(%arg0: i32, %arg1: i32) -> (i32, i32) {
    %c0_i32 = arith.constant 0 : i32
    %c0_i32_0 = arith.constant 0 : i32
    %c0_i32_1 = arith.constant 0 : i32
    return %c0_i32, %c0_i32_0 : i32, i32
  }
  func.func @transform_1(%arg0: i32, %arg1: i32) -> (i32, i32) {
    %c0_i32 = arith.constant 0 : i32
    %c0_i32_0 = arith.constant 0 : i32
    %c0_i32_1 = arith.constant 0 : i32
    return %c0_i32, %c0_i32_0 : i32, i32
  }
  func.func @transform_2(%arg0: i32, %arg1: i32) -> (i32, i32, i32) {
    %c0_i32 = arith.constant 0 : i32
    %c0_i32_0 = arith.constant 0 : i32
    return %arg0, %arg1, %c0_i32 : i32, i32, i32
  }
  func.func @transform_3(%arg0: i32, %arg1: i32) -> (i32, i32, i32) {
    %c0_i32 = arith.constant 0 : i32
    %c0_i32_0 = arith.constant 0 : i32
    return %arg0, %arg1, %c0_i32 : i32, i32, i32
  }
}

</mosaic_0001>

<bundles_post_ra>
// kernel: tpu_custom_call.1
= control target key start
LH: loop header
LB: loop body
LE: loop exit
PB: predicated region body
PF: predicated region fallthrough
CT: control target
= control target key end

     0   :  { %8 = vsyncpa [#allocation3], 0  ;;  %s244_s0 = inlined_call_operand.vmem [shape: s32[2,1], index: 0, kind: input, shape index: {}]   ;;  %s245_s1 = inlined_call_operand.vmem [shape: f32[2,16], index: 1, kind: input, shape index: {}]   ;;  %s246_s2 = inlined_call_operand.hbm [shape: f32[2,8,16], index: 2, kind: input, shape index: {}]   ;;  %s247_s3 = inlined_call_operand.hbm [shape: f32[2,8,32], index: 3, kind: output, shape index: {}]  }
   0x1   :  { %9 = vsyncpa [#allocation4], 0  ;;  %s199_s12 = smov [#allocation2]  }
   0x2   :  { %s19_s13 = sshll.u32 %s199_s12, 4  ;;  %s20_s13 = int_to_ptr.vmem [resolvable:$true] %s19_s13 }
   0x3   :  { %s163_s14 = scalar_lea.vmem %s20_s13, 256  ;;  %p168_p1 = scmp.lt.s32.totalorder %s20_s13, %s20_s13 }
   0x4   :  { %p164_p0 = scmp.ne.s32.totalorder %s20_s13, %s163_s14  ;;  %p169_p2 = scmp.lt.s32.totalorder %s163_s14, %s163_s14 }
   0x6   :  { %p170_p3 = por %p169_p2, %p168_p1 }
   0x8   :  { %p171_p4 = pnand %p170_p3, %p164_p0 }
   0xa   :  { %174 = shalt.err (!%p171_p4)
}
   0xb   :  { %s200_s15 = smov 128   ;;  %s201_s16 = smov 8  }
   0xc   :  { %25 = dma.hbm_to_vmem [thread:$0]  %s246_s2, 256, %s20_s13, [#allocation3], %s200_s15, %s200_s15, %s201_s16  }
   0xd   :  { %195 = dma.done.wait [#allocation3], 256  }
   0xe   :  { %196 = vsyncadd [#allocation3], 4294967040  ;;  %v35_v0 = vlaneseq  ;;  %v202_v1 = vmov 0   ;;  %v203_v2 = vmov 1966171168   ;;  %v112_v24 = vld [vmem:[#allocation2] sm:$0xff] }
   0xf   :  { %154 = vset.pattern.permute.xlu0 %v202_v1  ;;  %v48_v3 = vunpack.c.l.s4 %v203_v2  ;;  %v145_v8 = vld.sshfl [vmem:[%s244_s0] sm:$0x11 pattern:$0x75316420]  ;;  %s204_s0 = smov 16   ;;  %vm122_vm2 = vcmask 130048  }
  0x10   :  { %v36_v4 = vshrl.u32 %v35_v0, 7  ;;  %v46_v10 = vcombine.high %v145_v8, %v145_v8  ;;  %v146_v11 = vld.sshfl [vmem:[%s245_s1] sm:$0x11 pattern:$0x75316420]  ;;  %vm125_vm3 = vcmask 261120  }
  0x11   :  { %v49_v5 = vunpack.c.0.s8 %v48_v3  ;;  %v85_v12 = vcombine.high %v146_v11, %v146_v11  ;;  %s205_s1 = smov [#allocation5]   ;;  %v113_v27 = vld [vmem:[#allocation2 + $0x8] sm:$0xff] }
  0x12   :  { %v63_v7 = vsub.s32 0, %v36_v4  ;;  %s133_s2 = sshll.u32 %s205_s1, 4  ;;  %s134_s2 = int_to_ptr.vmem [resolvable:$true] %s133_s2 }
  0x13   :  { %v52_v6 = vsub.s32 %v49_v5, %v36_v4  ;;  %s175_s23 = scalar_lea.vmem %s134_s2, 256  ;;  %p180_p6 = scmp.lt.s32.totalorder %s134_s2, %s134_s2 }
  0x14   :  { %p176_p5 = scmp.ne.s32.totalorder %s134_s2, %s175_s23  ;;  %p181_p7 = scmp.lt.s32.totalorder %s175_s23, %s175_s23 }
  0x15   :  { %v53_v9 = vrot.slane %v145_v8, %v52_v6  ;;  %v92_v13 = vrot.slane %v146_v11, %v52_v6  ;;  %v60_v15 = vrot.slane %v46_v10, %v52_v6  ;;  %v99_v17 = vrot.slane %v85_v12, %v52_v6 }
  0x16   :  { %p182_p8 = por %p181_p7, %p180_p6 }
  0x17   :  { %v64_v14 = vrot.slane %v53_v9, %v63_v7  ;;  %v103_v16 = vrot.slane %v92_v13, %v63_v7  ;;  %v68_v18 = vrot.slane %v60_v15, %v63_v7  ;;  %v107_v19 = vrot.slane %v99_v17, %v63_v7 }
  0x18   :  { %p183_p9 = pnand %p182_p8, %p176_p5 }
  0x19   :  { %70 = vperm.xlu0 %154, %v64_v14  }
  0x1d   :  { %73 = vperm.xlu0 %154, %v68_v18  }
  0x94   :  { %v71_v20 = vpop.permute.xlu0 %70 }
  0x95   :  { %vm75_vm0 = vcmp.lt.s32.totalorder %v36_v4, %v71_v20 }
  0x96   :  { %v110_v21 = vsel %vm75_vm0, %v103_v16, 0.0 }
  0x97   :  { %116 = vrot.lane.b32.xlu1 %v110_v21, %s204_s0 }
  0x98   :  { %v74_v22 = vpop.permute.xlu0 %73 }
  0x99   :  { %vm76_vm1 = vcmp.lt.s32.totalorder %v36_v4, %v74_v22 }
  0x9a   :  { %v111_v23 = vsel %vm76_vm1, %v107_v19, 0.0 }
  0x9b   :  { %118 = vrot.lane.b32.xlu1 %v111_v23, %s204_s0 }
 0x109   :  { %v117_v25 = vpop.permute.xlu1 %116 }
 0x10a   :  { %v123_v26 = vsel %vm122_vm2, %v112_v24, %v117_v25 }
 0x10b   :  { %126 = vst.msk [vmem:[#allocation5] sm:$0xff] %vm125_vm3, %v123_v26 }
 0x10d   :  { %v119_v28 = vpop.permute.xlu1 %118 }
 0x10e   :  { %v124_v29 = vsel %vm122_vm2, %v113_v27, %v119_v28 }
 0x10f   :  { %127 = vst.msk [vmem:[#allocation5 + $0x8] sm:$0xff] %vm125_vm3, %v124_v29 }
 0x110   :  { %186 = shalt.err (!%p183_p9)
}
 0x111   :  { %139 = dma.vmem_to_hbm [thread:$0]  %s134_s2, 256, %s247_s3, [#allocation4], %s200_s15, %s200_s15, %s201_s16  }
 0x112   :  { %197 = dma.done.wait [#allocation4], 256  }
 0x113   :  { %198 = vsyncadd [#allocation4], 4294967040 }
 0x114   :  { %143 = vsyncpa [#allocation3], 1 }
 0x115   :  { %144 = vsyncpa [#allocation4], 1 }

</bundles_post_ra>
